<compile_context>
chip_gen: v6e
topology: v6e:2x2x1
jax: 0.10.0
libtpu: 0.0.40
codegen_flags: <defaults>
</compile_context>

<pallas_src>
import functools

import jax
import jax.numpy as jnp
from jax.experimental import pallas as pl
from jax.experimental.pallas import tpu as pltpu


def _ce_ls_kernel(x_ref, t_ref, loss_ref, *, ls_, n_dim):
    """x_ref: (tb, n_dim) logits, t_ref: (tb, 1) int32 labels, loss_ref: (tb, 1) f32."""
    x = x_ref[...].astype(jnp.float32)                 # (tb, n_dim)
    t = t_ref[...]                                     # (tb, 1)

    # Numerically-stable log-partition along the class (lane) axis.
    m = jnp.max(x, axis=-1, keepdims=True)             # (tb, 1)
    lse = jnp.log(jnp.sum(jnp.exp(x - m), axis=-1, keepdims=True))
    logz = m + lse                                     # (tb, 1)

    # x[t] via iota compare + masked lane reduction (no one-hot materialized).
    classes = jax.lax.broadcasted_iota(jnp.int32, x.shape, 1)
    x_t = jnp.sum(jnp.where(classes == t, x, 0.0), axis=-1, keepdims=True)
    x_sum = jnp.sum(x, axis=-1, keepdims=True)

    # sum_c(-logprobs_c * (onehot_c*ls + (1-ls)/n))
    #   = -ls*(x[t] - logZ) - ((1-ls)/n)*(sum(x) - n*logZ)
    uniform = (1.0 - ls_) / n_dim
    loss_ref[...] = -ls_ * (x_t - logz) - uniform * (x_sum - n_dim * logz)


def _vmem_capacity_bytes():
    try:
        return int(pltpu.get_tpu_info().vmem_capacity_bytes)
    except Exception:
        return 64 * 1024 * 1024  # conservative (v7x-class physical VMEM per TC)


def _choose_block_rows(batch, n_dim, itemsize, vmem_limit_bytes):
    # Budget ~60% of the scoped VMEM for: double-buffered input tile
    # (2 * itemsize bytes/elem) plus ~4 live full-tile f32 temporaries.
    budget = int(vmem_limit_bytes * 0.6)
    per_row = n_dim * (2 * itemsize + 4 * 4)
    rows = budget // max(per_row, 1)
    rows = min(rows, 1024, ((batch + 7) // 8) * 8)     # never (much) bigger than batch
    rows = max(8, (rows // 8) * 8)
    return int(rows)


def cross_entropy_label_smoothing(x, target, ls_=0.9, *, block_rows=None):
    """x: (B, n_dim) float logits (f32/bf16), target: (B,) int labels -> scalar f32."""
    B, n_dim = x.shape

    vmem_cap = _vmem_capacity_bytes()
    vmem_limit = min(int(vmem_cap * 0.75), 100 * 1024 * 1024)

    if block_rows is None:
        block_rows = _choose_block_rows(B, n_dim, x.dtype.itemsize, vmem_limit)
    assert block_rows % 8 == 0, "block_rows must be a multiple of 8"

    num_blocks = -(-B // block_rows)
    B_pad = num_blocks * block_rows
    if B_pad != B:
        x = jnp.pad(x, ((0, B_pad - B), (0, 0)))
        target = jnp.pad(target, ((0, B_pad - B),))
    target2d = target.astype(jnp.int32).reshape(B_pad, 1)

    kernel = functools.partial(_ce_ls_kernel, ls_=float(ls_), n_dim=int(n_dim))

    per_row = pl.pallas_call(
        kernel,
        out_shape=jax.ShapeDtypeStruct((B_pad, 1), jnp.float32),
        grid_spec=pltpu.PrefetchScalarGridSpec(
            num_scalar_prefetch=0,
            grid=(num_blocks,),
            in_specs=[
                pl.BlockSpec((block_rows, n_dim), lambda i: (i, 0)),
                pl.BlockSpec((block_rows, 1), lambda i: (i, 0)),
            ],
            out_specs=pl.BlockSpec((block_rows, 1), lambda i: (i, 0)),
        ),
        compiler_params=pltpu.CompilerParams(
            dimension_semantics=("parallel",),   # independent batch tiles
            vmem_limit_bytes=vmem_limit,
        ),
    )(x, target2d)

    # Final mean over real (unpadded) rows in plain JAX.
    return jnp.mean(per_row[:B, 0])


def _reference(x, target, ls_, n_dim):
    onehot = jax.nn.one_hot(target, n_dim, dtype=jnp.float32)
    tgt = onehot * ls_ + (1.0 - ls_) / n_dim
    logprobs = jax.nn.log_softmax(x.astype(jnp.float32), axis=-1)
    return jnp.mean(jnp.sum(-logprobs * tgt, axis=-1))


if __name__ == "__main__":
    key = jax.random.PRNGKey(0)
    kx, kt = jax.random.split(key)

    B, n_dim = 20, 32          # small shapes; B not a multiple of 8 to test padding
    ls_ = 0.9

    x = jax.random.normal(kx, (B, n_dim), dtype=jnp.float32)
    target = jax.random.randint(kt, (B,), 0, n_dim, dtype=jnp.int32)
    ref = _reference(x, target, ls_, n_dim)

    # 1) auto-sized block_rows (single block at this toy size)
    loss = jax.block_until_ready(cross_entropy_label_smoothing(x, target, ls_))
    assert jnp.allclose(loss, ref, rtol=1e-5, atol=1e-5), (loss, ref)

    # 2) forced small blocks -> multi-step grid + padded final block
    loss_small = jax.block_until_ready(
        cross_entropy_label_smoothing(x, target, ls_, block_rows=8)
    )
    assert jnp.allclose(loss_small, ref, rtol=1e-5, atol=1e-5), (loss_small, ref)

    # 3) bf16 logits end-to-end (f32 math happens in-kernel)
    loss_bf16 = jax.block_until_ready(
        cross_entropy_label_smoothing(x.astype(jnp.bfloat16), target, ls_)
    )
    assert jnp.allclose(loss_bf16, ref, rtol=5e-2, atol=5e-2), (loss_bf16, ref)

    print("KERNEL_OK")
</pallas_src>

<mosaic_0001>
module attributes {stable_mosaic.version = 11 : i64} {
  func.func @_ce_ls_kernel(%arg0: i32, %arg1: memref<24x32xf32, #tpu.memory_space<vmem>>, %arg2: memref<24x1xi32, #tpu.memory_space<vmem>>, %arg3: memref<24x1xf32, #tpu.memory_space<vmem>>) attributes {dimension_semantics = [#tpu.dimension_semantics<parallel>], iteration_bounds = array<i64: 1>, scalar_prefetch = 0 : i64, scratch_operands = 0 : i64, tpu.core_type = #tpu.core_type<tc>, window_params = [{transform_indices = @transform_0, window_bounds = array<i64: 24, 32>}, {transform_indices = @transform_1, window_bounds = array<i64: 24, 1>}, {transform_indices = @transform_2, window_bounds = array<i64: 24, 1>}]} {
    %c0 = arith.constant 0 : index
    %c0_0 = arith.constant 0 : index
    %0 = vector.load %arg1[%c0, %c0_0] : memref<24x32xf32, #tpu.memory_space<vmem>>, vector<24x32xf32>
    %c0_1 = arith.constant 0 : index
    %c0_2 = arith.constant 0 : index
    %1 = vector.load %arg2[%c0_1, %c0_2] : memref<24x1xi32, #tpu.memory_space<vmem>>, vector<24x1xi32>
    %cst = arith.constant dense<0xFF800000> : vector<24xf32>
    %2 = vector.multi_reduction <maximumf>, %0, %cst [1] : vector<24x32xf32> to vector<24xf32>
    %3 = vector.shape_cast %2 : vector<24xf32> to vector<24x1xf32>
    %4 = vector.broadcast %3 : vector<24x1xf32> to vector<24x32xf32>
    %5 = arith.subf %0, %4 : vector<24x32xf32>
    %6 = math.exp %5 : vector<24x32xf32>
    %cst_3 = arith.constant dense<0.000000e+00> : vector<24xf32>
    %7 = vector.multi_reduction <add>, %6, %cst_3 [1] : vector<24x32xf32> to vector<24xf32>
    %8 = vector.shape_cast %7 : vector<24xf32> to vector<24x1xf32>
    %9 = math.log %8 : vector<24x1xf32>
    %10 = arith.addf %3, %9 : vector<24x1xf32>
    %11 = tpu.iota {dimensions = array<i32: 1>} : vector<24x32xi32>
    %12 = vector.broadcast %1 : vector<24x1xi32> to vector<24x32xi32>
    %13 = arith.cmpi eq, %11, %12 : vector<24x32xi32>
    %cst_4 = arith.constant 0.000000e+00 : f32
    %14 = vector.broadcast %cst_4 : f32 to vector<24x32xf32>
    %15 = arith.select %13, %0, %14 : vector<24x32xi1>, vector<24x32xf32>
    %cst_5 = arith.constant dense<0.000000e+00> : vector<24xf32>
    %16 = vector.multi_reduction <add>, %15, %cst_5 [1] : vector<24x32xf32> to vector<24xf32>
    %17 = vector.shape_cast %16 : vector<24xf32> to vector<24x1xf32>
    %cst_6 = arith.constant dense<0.000000e+00> : vector<24xf32>
    %18 = vector.multi_reduction <add>, %0, %cst_6 [1] : vector<24x32xf32> to vector<24xf32>
    %19 = vector.shape_cast %18 : vector<24xf32> to vector<24x1xf32>
    %20 = arith.subf %17, %10 : vector<24x1xf32>
    %cst_7 = arith.constant -0.899999976 : f32
    %21 = vector.broadcast %cst_7 : f32 to vector<24x1xf32>
    %22 = arith.mulf %21, %20 : vector<24x1xf32>
    %cst_8 = arith.constant 3.200000e+01 : f32
    %23 = vector.broadcast %cst_8 : f32 to vector<24x1xf32>
    %24 = arith.mulf %23, %10 : vector<24x1xf32>
    %25 = arith.subf %19, %24 : vector<24x1xf32>
    %cst_9 = arith.constant 3.125000e-03 : f32
    %26 = vector.broadcast %cst_9 : f32 to vector<24x1xf32>
    %27 = arith.mulf %26, %25 : vector<24x1xf32>
    %28 = arith.subf %22, %27 : vector<24x1xf32>
    %c0_10 = arith.constant 0 : index
    %c0_11 = arith.constant 0 : index
    %29 = vector.load %arg3[%c0_10, %c0_11] : memref<24x1xf32, #tpu.memory_space<vmem>>, vector<24x1xf32>
    tpu.vector_store %arg3[%c0_10, %c0_11], %28 {strides = array<i32>} : memref<24x1xf32, #tpu.memory_space<vmem>>, vector<24x1xf32>,
    return
  }
  func.func @transform_0(%arg0: i32) -> (i32, i32) {
    %c0_i32 = arith.constant 0 : i32
    %c0_i32_0 = arith.constant 0 : i32
    return %arg0, %c0_i32 : i32, i32
  }
  func.func @transform_1(%arg0: i32) -> (i32, i32) {
    %c0_i32 = arith.constant 0 : i32
    %c0_i32_0 = arith.constant 0 : i32
    return %arg0, %c0_i32 : i32, i32
  }
  func.func @transform_2(%arg0: i32) -> (i32, i32) {
    %c0_i32 = arith.constant 0 : i32
    %c0_i32_0 = arith.constant 0 : i32
    return %arg0, %c0_i32 : i32, i32
  }
}

</mosaic_0001>

<bundles_post_ra>
// kernel: tpu_custom_call.1
= control target key start
LH: loop header
LB: loop body
LE: loop exit
PB: predicated region body
PF: predicated region fallthrough
CT: control target
= control target key end

     0   :  { %vm17_vm0 = vcmask 261120   ;;  %v130_v3 = vmov 0   ;;  %v54_v19 = vlaneseq  ;;  %vm107_vm4 = vcmask 7168   ;;  %s185_s0 = inlined_call_operand.vmem [shape: f32[24,32], index: 0, kind: input, shape index: {}]   ;;  %s186_s1 = inlined_call_operand.vmem [shape: s32[24,1], index: 1, kind: input, shape index: {}]   ;;  %s187_s2 = inlined_call_operand.vmem [shape: f32[24,1], index: 2, kind: output, shape index: {}]  }
   0x1   :  { %v11_v0 = vld [vmem:[%s185_s0] sm:$0xff]  ;;  %v13_v1 = vld [vmem:[%s185_s0 + $0x10] sm:$0xff]  ;;  %v12_v2 = vld [vmem:[%s185_s0 + $0x8] sm:$0xff]  ;;  %116 = vset.pattern.permute.xlu1 %v130_v3  ;;  %117 = vset.pattern.permute.xlu0 %v130_v3 }
   0x2   :  { %v18_v4 = vsel %vm17_vm0, %v11_v0, -inf  ;;  %v24_v5 = vsel %vm17_vm0, %v13_v1, -inf  ;;  %v21_v6 = vsel %vm17_vm0, %v12_v2, -inf  ;;  %v14_v7 = vld [vmem:[%s186_s1] sm:$0xff]  ;;  %v16_v8 = vld [vmem:[%s186_s1 + $0x10] sm:$0xff]  ;;  %v15_v9 = vld [vmem:[%s186_s1 + $0x8] sm:$0xff] }
   0x3   :  { %19 = vmax.xlane.f32.xlu0 %v18_v4  ;;  %25 = vmax.xlane.f32.xlu1 %v24_v5  ;;  %v55_v20 = vand.u32 127, %v54_v19  ;;  %v86_v31 = vsel %vm17_vm0, %v13_v1, 0.0  ;;  %v80_v37 = vsel %vm17_vm0, %v11_v0, 0.0  ;;  %v83_v38 = vsel %vm17_vm0, %v12_v2, 0.0 }
   0x7   :  { %22 = vmax.xlane.f32.xlu0 %v21_v6 }
  0x14   :  { %57 = vperm.xlu1 %116, %v14_v7  }
  0x18   :  { %63 = vperm.xlu1 %116, %v16_v8  }
  0x1d   :  { %60 = vperm.xlu0 %117, %v15_v9  }
  0x8c   :  { %v20_v10 = vpop.xlane.xlu0 %19  ;;  %v26_v11 = vpop.xlane.xlu1 %25 }
  0x8d   :  { %v27_v12 = vsub.f32 %v11_v0, %v20_v10  ;;  %v29_v13 = vsub.f32 %v13_v1, %v26_v11 }
  0x8f   :  { %v30_v14 = vmul.f32 1.442695, %v27_v12  ;;  %v34_v15 = vmul.f32 1.442695, %v29_v13 }
  0x90   :  { %v23_v16 = vpop.xlane.xlu0 %22  ;;  %v58_v22 = vpop.permute.xlu1 %57 }
  0x91   :  { %118 = vpow2.f32 %v30_v14  ;;  %v28_v17 = vsub.f32 %v12_v2, %v23_v16  ;;  %vm65_vm1 = vcmp.eq.s32.totalorder %v55_v20, %v58_v22 }
  0x92   :  { %120 = vpow2.f32 %v34_v15  ;;  %v68_v28 = vsel %vm65_vm1, %v11_v0, 0.0 }
  0x93   :  { %v32_v18 = vmul.f32 1.442695, %v28_v17  ;;  %v71_v30 = vsel %vm17_vm0, %v68_v28, 0.0 }
  0x94   :  { %v64_v32 = vpop.permute.xlu1 %63 }
  0x95   :  { %122 = vpow2.f32 %v32_v18  ;;  %vm67_vm3 = vcmp.eq.s32.totalorder %v55_v20, %v64_v32 }
  0x96   :  { %v70_v35 = vsel %vm67_vm3, %v13_v1, 0.0 }
  0x97   :  { %v77_v36 = vsel %vm17_vm0, %v70_v35, 0.0 }
  0x98   :  { %v61_v25 = vpop.permute.xlu0 %60 }
  0x99   :  { %vm66_vm2 = vcmp.eq.s32.totalorder %v55_v20, %v61_v25 }
  0x9a   :  { %v69_v33 = vsel %vm66_vm2, %v12_v2, 0.0 }
  0x9b   :  { %v74_v34 = vsel %vm17_vm0, %v69_v33, 0.0 }
  0x9e   :  { %v119_v21 = vpop.eup %118 }
  0x9f   :  { %v121_v23 = vpop.eup %120  ;;  %v36_v24 = vsel %vm17_vm0, %v119_v21, 0.0 }
  0xa0   :  { %37 = vadd.xlane.f32.xlu1 %v36_v24  ;;  %v42_v26 = vsel %vm17_vm0, %v121_v23, 0.0 }
  0xa2   :  { %v123_v27 = vpop.eup %122 }
  0xa3   :  { %v39_v29 = vsel %vm17_vm0, %v123_v27, 0.0 }
  0xa4   :  { %43 = vadd.xlane.f32.xlu1 %v42_v26  ;;  %40 = vadd.xlane.f32.xlu0 %v39_v29 }
  0xa8   :  { %72 = vadd.xlane.f32.xlu1 %v71_v30  ;;  %87 = vadd.xlane.f32.xlu0 %v86_v31 }
  0xac   :  { %75 = vadd.xlane.f32.xlu1 %v74_v34 }
  0xb0   :  { %78 = vadd.xlane.f32.xlu1 %v77_v36 }
  0xb4   :  { %81 = vadd.xlane.f32.xlu1 %v80_v37 }
  0xb8   :  { %84 = vadd.xlane.f32.xlu1 %v83_v38 }
 0x129   :  { %v38_v39 = vpop.xlane.xlu1 %37 }
 0x12a   :  { %124 = vlog2.f32 %v38_v39 }
 0x12d   :  { %v44_v40 = vpop.xlane.xlu1 %43  ;;  %v41_v41 = vpop.xlane.xlu0 %40 }
 0x12e   :  { %126 = vlog2.f32 %v44_v40 }
 0x12f   :  { %128 = vlog2.f32 %v41_v41 }
 0x131   :  { %v73_v42 = vpop.xlane.xlu1 %72  ;;  %v88_v58 = vpop.xlane.xlu0 %87 }
 0x135   :  { %v76_v43 = vpop.xlane.xlu1 %75 }
 0x137   :  { %v125_v44 = vpop.eup %124 }
 0x138   :  { %v46_v45 = vmul.f32 0.6931472, %v125_v44 }
 0x139   :  { %v79_v46 = vpop.xlane.xlu1 %78 }
 0x13a   :  { %v51_v47 = vadd.f32 %v46_v45, %v20_v10 }
 0x13b   :  { %v127_v48 = vpop.eup %126 }
 0x13c   :  { %v129_v49 = vpop.eup %128  ;;  %v50_v50 = vmul.f32 0.6931472, %v127_v48  ;;  %v89_v51 = vsub.f32 %v73_v42, %v51_v47  ;;  %v95_v52 = vmul.f32 32.0, %v51_v47 }
 0x13d   :  { %v48_v53 = vmul.f32 0.6931472, %v129_v49  ;;  %v82_v54 = vpop.xlane.xlu1 %81 }
 0x13e   :  { %v53_v55 = vadd.f32 %v50_v50, %v26_v11  ;;  %v98_v56 = vsub.f32 %v82_v54, %v95_v52  ;;  %v92_v59 = vmul.f32 -0.9, %v89_v51 }
 0x13f   :  { %v52_v57 = vadd.f32 %v48_v53, %v23_v16 }
 0x140   :  { %v91_v60 = vsub.f32 %v79_v46, %v53_v55  ;;  %v101_v61 = vmul.f32 0.003125, %v98_v56  ;;  %v97_v62 = vmul.f32 32.0, %v53_v55 }
 0x141   :  { %v90_v63 = vsub.f32 %v76_v43, %v52_v57  ;;  %v85_v0 = vpop.xlane.xlu1 %84  ;;  %v96_v1 = vmul.f32 32.0, %v52_v57 }
 0x142   :  { %v104_v2 = vsub.f32 %v92_v59, %v101_v61  ;;  %v100_v3 = vsub.f32 %v88_v58, %v97_v62  ;;  %v94_v5 = vmul.f32 -0.9, %v91_v60 }
 0x143   :  { %v99_v4 = vsub.f32 %v85_v0, %v96_v1  ;;  %v93_v7 = vmul.f32 -0.9, %v90_v63 }
 0x144   :  { %108 = vst.msk [vmem:[%s187_s2] sm:$0xff] %vm107_vm4, %v104_v2  ;;  %v103_v6 = vmul.f32 0.003125, %v100_v3 }
 0x145   :  { %v102_v8 = vmul.f32 0.003125, %v99_v4 }
 0x146   :  { %v106_v9 = vsub.f32 %v94_v5, %v103_v6 }
 0x147   :  { %v105_v10 = vsub.f32 %v93_v7, %v102_v8 }
 0x148   :  { %110 = vst.msk [vmem:[%s187_s2 + $0x10] sm:$0xff] %vm107_vm4, %v106_v9 }
 0x149   :  { %109 = vst.msk [vmem:[%s187_s2 + $0x8] sm:$0xff] %vm107_vm4, %v105_v10 }

</bundles_post_ra>
